<compile_context>
chip_gen: v7x
topology: tpu7x:2x2x1
jax: 0.10.0
libtpu: 0.0.40
codegen_flags: <defaults>
</compile_context>

<pallas_src>
import functools

import jax
import jax.numpy as jnp
from jax.experimental import pallas as pl
from jax.experimental.pallas import tpu as pltpu

_LANE = 128
_BLOCK_BYTES = 6 << 20        # ~6 MiB per (VMEM-padded) input block -> 12 MiB double-buffered
_TN_CAP = 16384               # lane-width cap => <=128 unrolled lane-group folds per stream
_VMEM_LIMIT = 32 << 20        # explicit scoped-VMEM limit: safe on v5e / v6e / v7x


# ----------------------------------------------------------------------------
# Static tiling plan (shape-only Python).
# ----------------------------------------------------------------------------
def _plan(batch, n):
    """Plan the pad-free packed layout (batch, n) -> (R, width) and its width tiling."""
    # Pack each batch row over `rpb` sublane rows. rpb must divide n so the reshape is a
    # free (contiguous) reshape with no padding. Grow while width stays >= 128 lanes and
    # R stays moderate; this keeps vregs sublane-dense even for batch < 8.
    rpb = 1
    while (n % (rpb * 2) == 0 and n // (rpb * 2) >= _LANE
           and rpb * 2 <= 64 and batch * rpb * 2 <= 4096):
        rpb *= 2
    r = batch * rpb
    width = n // rpb
    r_vmem = ((max(r, 8) + 7) // 8) * 8              # sublane-padded rows (VMEM footprint)
    tn = max(_LANE, (_BLOCK_BYTES // (r_vmem * 4)) // _LANE * _LANE)
    tn = min(tn, _TN_CAP)
    if tn >= width:
        tn = width                                    # single block along width
    total_steps = pl.cdiv(width, tn)
    # 2-way split of the width axis across TensorCores (v7x). Skip it when an odd step
    # count would add a phantom block re-read worth >~10% of the traffic on 1-TC chips.
    if total_steps >= 2 and (total_steps % 2 == 0 or total_steps >= 9):
        n_splits = 2
    else:
        n_splits = 1
    sps = pl.cdiv(total_steps, n_splits)              # grid steps per split
    return rpb, r, width, tn, total_steps, n_splits, sps


# ----------------------------------------------------------------------------
# In-kernel helpers.
# ----------------------------------------------------------------------------
def _fold_lane_groups(v, acc_ref, tn):
    """acc_ref (R, 128) += per-row sum of v (R, tn) folded over 128-lane groups.

    VPU-only in the hot path: the 128-lane slices are tile-aligned and the adds are plain
    vreg adds (no XLU); the single cross-lane reduce happens later in the XLA epilogue.
    """
    n_full = tn // _LANE
    if n_full == 0:                                   # tiny single-block width (< 128 lanes)
        acc_ref[:, :tn] += v
        return
    part = v[:, 0:_LANE]
    for g in range(1, n_full):
        part = part + v[:, g * _LANE:(g + 1) * _LANE]
    acc_ref[...] += part
    rem = tn - n_full * _LANE
    if rem:                                           # only possible when tn == width
        acc_ref[:, :rem] += v[:, n_full * _LANE:]


# ----------------------------------------------------------------------------
# Kernels.
# ----------------------------------------------------------------------------
def _make_vector_kernel(norm, r, tn, sps, total_steps, tail_cols, needs_gate):
    """use_vector=True: stream per-row |x| / x^2 lane partials into a (R,128) accumulator."""
    assert norm in ("l1", "l2")
    last = total_steps - 1

    def kernel(x_ref, o_ref, acc_ref):
        c = pl.program_id(0)                          # core-split index ("parallel")
        k = pl.program_id(1)                          # width-block index within the split

        @pl.when(k == 0)
        def _init():
            acc_ref[...] = jnp.zeros_like(acc_ref)

        x = x_ref[...].astype(jnp.float32)            # (R, TN)
        v = jnp.abs(x) if norm == "l1" else x * x     # 1 VPU op / element

        if needs_gate:
            kg = c * sps + k                          # global width-block index

            @pl.when(kg == last)
            def _last():                              # mask the unspecified tail lanes
                col = jax.lax.broadcasted_iota(jnp.int32, (r, tn), 1)
                _fold_lane_groups(jnp.where(col < tail_cols, v, 0.0), acc_ref, tn)

            @pl.when(kg < last)
            def _body():
                _fold_lane_groups(v, acc_ref, tn)
            # kg > last: phantom step of the split -> contributes nothing.
        else:
            _fold_lane_groups(v, acc_ref, tn)

        @pl.when(k == sps - 1)
        def _finalize():
            o_ref[0, :, :] = acc_ref[...]             # lane-dense (R, 128) store, once

    return kernel


def _make_elementwise_kernel(margin, norm, r, tn, sps, total_steps, tail_cols, needs_gate):
    """use_vector=False: stream the 4 global partials (sum/count, upper/lower)."""
    assert norm in ("l1", "l2")
    last = total_steps - 1
    m = float(margin)

    def kernel(x_ref, o_ref, su_ref, sl_ref, cu_ref, cl_ref):
        c = pl.program_id(0)
        k = pl.program_id(1)

        @pl.when(k == 0)
        def _init():
            su_ref[...] = jnp.zeros_like(su_ref)
            sl_ref[...] = jnp.zeros_like(sl_ref)
            cu_ref[...] = jnp.zeros_like(cu_ref)
            cl_ref[...] = jnp.zeros_like(cl_ref)

        x = x_ref[...].astype(jnp.float32)            # (R, TN)

        def contrib_fold(valid):
            d_up = x - m
            d_lo = x + m
            gt = d_up > 0.0                           # one compare per side, reused
            lt = d_lo < 0.0
            if valid is not None:
                gt = jnp.logical_and(gt, valid)
                lt = jnp.logical_and(lt, valid)
            if norm == "l2":
                su_c = jnp.where(gt, d_up * d_up, 0.0)
                sl_c = jnp.where(lt, d_lo * d_lo, 0.0)
            else:
                su_c = jnp.where(gt, d_up, 0.0)       # relu output >= 0: reference abs() redundant
                sl_c = jnp.where(lt, -d_lo, 0.0)
            _fold_lane_groups(su_c, su_ref, tn)
            _fold_lane_groups(sl_c, sl_ref, tn)
            _fold_lane_groups(jnp.where(gt, 1.0, 0.0), cu_ref, tn)
            _fold_lane_groups(jnp.where(lt, 1.0, 0.0), cl_ref, tn)

        if needs_gate:
            kg = c * sps + k

            @pl.when(kg == last)
            def _last():
                col = jax.lax.broadcasted_iota(jnp.int32, (r, tn), 1)
                contrib_fold(col < tail_cols)

            @pl.when(kg < last)
            def _body():
                contrib_fold(None)
        else:
            contrib_fold(None)

        @pl.when(k == sps - 1)
        def _finalize():
            o_ref[0, 0, :, :] = su_ref[...]
            o_ref[0, 1, :, :] = sl_ref[...]
            o_ref[0, 2, :, :] = cu_ref[...]
            o_ref[0, 3, :, :] = cl_ref[...]

    return kernel


# ----------------------------------------------------------------------------
# Wrapper (layout plumbing + tiny scalar epilogue; hot path is inside the kernel).
# ----------------------------------------------------------------------------
@functools.partial(jax.jit, static_argnames=("margin", "norm", "epsilon", "use_vector"))
def penalty_prior(module_input,
                  margin: float = 1.0,
                  norm: str = "l2",
                  epsilon: float = 1e-7,
                  use_vector: bool = True):
    """Pallas implementation of PenaltyPrior.forward -> scalar float32."""
    assert norm in ("l1", "l2"), "Norm variable must me l1 or l2"
    batch = module_input.shape[0]
    x = module_input
    if x.dtype not in (jnp.float32, jnp.bfloat16):
        x = x.astype(jnp.float32)
    x2d = jnp.reshape(x, (batch, -1))                 # same as `view(batch_size, -1)`
    n = x2d.shape[1]

    rpb, r, width, tn, total_steps, n_splits, sps = _plan(batch, n)
    xp = jnp.reshape(x2d, (r, width))                 # contiguous reshape: free, no pad
    has_tail = (width % tn) != 0
    has_phantom = n_splits * sps > total_steps
    needs_gate = has_tail or has_phantom
    tail_cols = width - (total_steps - 1) * tn        # valid lanes in the globally-last block

    if has_phantom:
        def in_index(c, k):                           # clamp phantom steps onto the last block
            return (0, jnp.minimum(c * sps + k, total_steps - 1))
    else:
        def in_index(c, k):
            return (0, c * sps + k)

    compiler_params = pltpu.CompilerParams(
        dimension_semantics=("parallel", "arbitrary"),
        vmem_limit_bytes=_VMEM_LIMIT,
    )
    n_elem = batch * n
    in_bytes = xp.size * xp.dtype.itemsize

    if use_vector:
        kernel = _make_vector_kernel(norm, r, tn, sps, total_steps, tail_cols, needs_gate)
        partials = pl.pallas_call(
            kernel,
            out_shape=jax.ShapeDtypeStruct((n_splits, r, _LANE), jnp.float32),
            grid_spec=pltpu.PrefetchScalarGridSpec(
                num_scalar_prefetch=0,
                grid=(n_splits, sps),
                in_specs=[pl.BlockSpec((r, tn), in_index)],
                out_specs=pl.BlockSpec((1, r, _LANE), lambda c, k: (c, 0, 0)),
                scratch_shapes=[pltpu.VMEM((r, _LANE), jnp.float32)],
            ),
            compiler_params=compiler_params,
            cost_estimate=pl.CostEstimate(
                flops=2 * n_elem, transcendentals=0,
                bytes_accessed=in_bytes + n_splits * r * _LANE * 4),
        )(xp)
        # Few-KB XLA epilogue: per-batch norms -> threshold -> mean over nonzero rows.
        norms = jnp.sum(partials, axis=(0, 2)).reshape(batch, rpb).sum(axis=-1)
        m = float(margin) if norm == "l1" else float(margin) ** 2
        t = jnp.maximum(norms - m, 0.0)
        nz = jnp.sum((t > 0.0).astype(jnp.float32)) + float(epsilon)
        return jnp.sum(t) / nz

    kernel = _make_elementwise_kernel(float(margin), norm, r, tn, sps, total_steps,
                                      tail_cols, needs_gate)
    parts = pl.pallas_call(
        kernel,
        out_shape=jax.ShapeDtypeStruct((n_splits, 4, r, _LANE), jnp.float32),
        grid_spec=pltpu.PrefetchScalarGridSpec(
            num_scalar_prefetch=0,
            grid=(n_splits, sps),
            in_specs=[pl.BlockSpec((r, tn), in_index)],
            out_specs=pl.BlockSpec((1, 4, r, _LANE), lambda c, k: (c, 0, 0, 0)),
            scratch_shapes=[pltpu.VMEM((r, _LANE), jnp.float32)] * 4,
        ),
        compiler_params=compiler_params,
        cost_estimate=pl.CostEstimate(
            flops=12 * n_elem, transcendentals=0,
            bytes_accessed=in_bytes + n_splits * 4 * r * _LANE * 4),
    )(xp)
    sums = jnp.sum(parts, axis=(0, 2, 3))             # (4,) = [sum_up, sum_lo, cnt_up, cnt_lo]
    eps = float(epsilon)
    return sums[0] / (sums[2] + eps) + sums[1] / (sums[3] + eps)


# ----------------------------------------------------------------------------
# Pure-JAX reference mirroring the PyTorch forward, for verification.
# ----------------------------------------------------------------------------
def _reference(module_input, margin=1.0, norm="l2", epsilon=1e-7, use_vector=True):
    b = module_input.shape[0]
    x = jnp.reshape(module_input, (b, -1)).astype(jnp.float32)
    if use_vector:
        if norm == "l1":
            pn = jnp.sum(jnp.abs(x), axis=-1); m = margin
        else:
            pn = jnp.sum(x * x, axis=-1); m = margin ** 2
        t = jnp.maximum(pn - m, 0.0)
        nz = jnp.sum((t > 0).astype(jnp.float32)) + epsilon
        return jnp.sum(t) / nz
    upper = jnp.maximum(x - margin, 0.0)
    lower = jnp.maximum(-(x + margin), 0.0)
    unz = jnp.sum((upper > 0).astype(jnp.float32)) + epsilon
    lnz = jnp.sum((lower > 0).astype(jnp.float32)) + epsilon
    if norm == "l1":
        return jnp.sum(jnp.abs(upper)) / unz + jnp.sum(jnp.abs(lower)) / lnz
    return jnp.sum(upper * upper) / unz + jnp.sum(lower * lower) / lnz


if __name__ == "__main__":
    key = jax.random.PRNGKey(0)
    k1, k2 = jax.random.split(key)
    # Small NCHW-style parameter blob: batch=2, C=4, H=W=16 (n=1024, single-block path).
    x_small = jax.random.normal(k1, (2, 4, 16, 16), dtype=jnp.float32)
    # Odd-length parameter vector: exercises the pad-free tail mask + 2-way split path.
    x_odd = jax.random.normal(k2, (2, 16411), dtype=jnp.float32)

    configs = [
        dict(margin=1.0, norm="l2", epsilon=1e-7, use_vector=True),    # module defaults
        dict(margin=1.0, norm="l1", epsilon=1e-7, use_vector=True),
        dict(margin=1.0, norm="l2", epsilon=1e-7, use_vector=False),
        dict(margin=0.5, norm="l1", epsilon=1e-7, use_vector=False),
    ]
    for x_in in (x_small, x_odd):
        for cfg in configs:
            out = jax.block_until_ready(penalty_prior(x_in, **cfg))
            ref = jax.block_until_ready(_reference(x_in, **cfg))
            assert jnp.allclose(out, ref, rtol=1e-5, atol=1e-5), (x_in.shape, cfg, out, ref)

    print("KERNEL_OK")
</pallas_src>

<mosaic_0001>
module attributes {stable_mosaic.version = 11 : i64} {
  func.func @kernel(%arg0: i32, %arg1: i32, %arg2: memref<16x128xf32, #tpu.memory_space<vmem>>, %arg3: memref<1x16x128xf32, #tpu.memory_space<vmem>>, %arg4: memref<16x128xf32, #tpu.memory_space<vmem>>) attributes {dimension_semantics = [#tpu.dimension_semantics<parallel>, #tpu.dimension_semantics<arbitrary>], iteration_bounds = array<i64: 1, 1>, scalar_prefetch = 0 : i64, scratch_operands = 1 : i64, tpu.core_type = #tpu.core_type<tc>, window_params = [{transform_indices = @transform_0, window_bounds = array<i64: 16, 128>}, {transform_indices = @transform_1, window_bounds = array<i64: 1, 16, 128>}]} {
    %c0_i32 = arith.constant 0 : i32
    %0 = arith.cmpi eq, %arg1, %c0_i32 : i32
    %1 = arith.extui %0 : i1 to i32
    %c0_i32_0 = arith.constant 0 : i32
    %2 = arith.cmpi ne, %1, %c0_i32_0 : i32
    scf.if %2 {
      %cst = arith.constant 0.000000e+00 : f32
      %11 = vector.broadcast %cst : f32 to vector<16x128xf32>
      %c0_8 = arith.constant 0 : index
      %c0_9 = arith.constant 0 : index
      %12 = vector.load %arg4[%c0_8, %c0_9] : memref<16x128xf32, #tpu.memory_space<vmem>>, vector<16x128xf32>
      tpu.vector_store %arg4[%c0_8, %c0_9], %11 {strides = array<i32>} : memref<16x128xf32, #tpu.memory_space<vmem>>, vector<16x128xf32>,
    } else {
    }
    %c0 = arith.constant 0 : index
    %c0_1 = arith.constant 0 : index
    %3 = vector.load %arg2[%c0, %c0_1] : memref<16x128xf32, #tpu.memory_space<vmem>>, vector<16x128xf32>
    %4 = arith.mulf %3, %3 : vector<16x128xf32>
    %c0_2 = arith.constant 0 : index
    %c0_3 = arith.constant 0 : index
    %5 = vector.load %arg4[%c0_2, %c0_3] : memref<16x128xf32, #tpu.memory_space<vmem>>, vector<16x128xf32>
    %6 = arith.addf %5, %4 : vector<16x128xf32>
    %c0_4 = arith.constant 0 : index
    %c0_5 = arith.constant 0 : index
    %7 = vector.load %arg4[%c0_4, %c0_5] : memref<16x128xf32, #tpu.memory_space<vmem>>, vector<16x128xf32>
    tpu.vector_store %arg4[%c0_4, %c0_5], %6 {strides = array<i32>} : memref<16x128xf32, #tpu.memory_space<vmem>>, vector<16x128xf32>,
    %c0_i32_6 = arith.constant 0 : i32
    %8 = arith.cmpi eq, %arg1, %c0_i32_6 : i32
    %9 = arith.extui %8 : i1 to i32
    %c0_i32_7 = arith.constant 0 : i32
    %10 = arith.cmpi ne, %9, %c0_i32_7 : i32
    scf.if %10 {
      %c0_8 = arith.constant 0 : index
      %c0_9 = arith.constant 0 : index
      %11 = vector.load %arg4[%c0_8, %c0_9] : memref<16x128xf32, #tpu.memory_space<vmem>>, vector<16x128xf32>
      %c0_10 = arith.constant 0 : index
      %c0_11 = arith.constant 0 : index
      %c0_12 = arith.constant 0 : index
      %12 = vector.load %arg3[%c0_10, %c0_11, %c0_12] : memref<1x16x128xf32, #tpu.memory_space<vmem>>, vector<1x16x128xf32>
      %13 = vector.shape_cast %12 : vector<1x16x128xf32> to vector<16x128xf32>
      %14 = vector.shape_cast %11 : vector<16x128xf32> to vector<1x16x128xf32>
      tpu.vector_store %arg3[%c0_10, %c0_11, %c0_12], %14 {strides = array<i32>} : memref<1x16x128xf32, #tpu.memory_space<vmem>>, vector<1x16x128xf32>,
    } else {
    }
    return
  }
  func.func @transform_0(%arg0: i32, %arg1: i32) -> (i32, i32) {
    %c1_i32 = arith.constant 1 : i32
    %0 = arith.muli %arg0, %c1_i32 : i32
    %1 = arith.addi %0, %arg1 : i32
    %c0_i32 = arith.constant 0 : i32
    %c0_i32_0 = arith.constant 0 : i32
    return %c0_i32, %1 : i32, i32
  }
  func.func @transform_1(%arg0: i32, %arg1: i32) -> (i32, i32, i32) {
    %c0_i32 = arith.constant 0 : i32
    %c0_i32_0 = arith.constant 0 : i32
    %c0_i32_1 = arith.constant 0 : i32
    return %arg0, %c0_i32, %c0_i32_0 : i32, i32, i32
  }
}

</mosaic_0001>

<bundles_post_ra>
// kernel: penalty_prior.1
= control target key start
LH: loop header
LB: loop body
LE: loop exit
PB: predicated region body
PF: predicated region fallthrough
CT: control target
= control target key end

     0   :  { %s80_s0 = inlined_call_operand.vmem [shape: f32[16,128], index: 0, kind: input, shape index: {}]   ;;  %s81_s1 = inlined_call_operand.vmem [shape: f32[1,16,128], index: 1, kind: output, shape index: {}]  }
   0x1   :  { %v31_v0 = vld [vmem:[%s80_s0] sm:$0xff]  ;;  %v32_v1 = vld [vmem:[%s80_s0 + $0x8] sm:$0xff] }
   0x2   :  { %v33_v2 = vmul.f32 %v31_v0, %v31_v0  ;;  %v34_v3 = vmul.f32 %v32_v1, %v32_v1 }
   0x4   :  { %46 = vst [vmem:[%s81_s1] sm:$0xff] %v33_v2  ;;  %47 = vst [vmem:[%s81_s1 + $0x8] sm:$0xff] %v34_v3 }

</bundles_post_ra>
